<compile_context>
chip_gen: v7x
topology: tpu7x:2x2x1
jax: 0.10.0
libtpu: 0.0.40
codegen_flags: <defaults>
</compile_context>

<pallas_src>
import functools

import jax
import jax.numpy as jnp
from jax import lax
from jax.experimental import pallas as pl
from jax.experimental.pallas import tpu as pltpu


def _round_up(x, m):
    return (x + m - 1) // m * m


def pdenet_kernel(x_ref, w1c0_ref, w1c1_ref, b1_ref, w2_ref, b2_ref, o_ref):
    """One batch tile of the PDEnet MLP, entirely on the VPU/EUP/XLU.

    x_ref : (2, TB)              w1c0/w1c1/b1/w2 refs: (NP, CHUNK) lane-splats
    b2_ref: (1,) SMEM scalar     o_ref : (1, TB) lane-dense output row
    """
    npad, chunk = w1c0_ref.shape
    tb = o_ref.shape[1]
    n_chunks = tb // chunk
    b2 = b2_ref[0]

    def body(c, carry):
        off = pl.multiple_of(c * chunk, 128)
        x0 = x_ref[0:1, pl.ds(off, chunk)]                       # (1, CHUNK)
        x1 = x_ref[1:2, pl.ds(off, chunk)]                       # (1, CHUNK)
        # fc1: K=2 contraction as two broadcast multiply-adds (never the MXU).
        h = w1c0_ref[...] * x0 + w1c1_ref[...] * x1 + b1_ref[...]  # (NP, CHUNK)
        # sigmoid(h) = 0.5*tanh(0.5*h) + 0.5  -> one EUP push per element.
        h = 0.5 * jnp.tanh(0.5 * h) + 0.5
        # fc2: elementwise mul + sublane reduction -> lane-dense (1, CHUNK) row.
        # Padded rows of w2 are zero, so padded hidden units drop out here.
        y = jnp.sum(h * w2_ref[...], axis=0, keepdims=True) + b2
        o_ref[0:1, pl.ds(off, chunk)] = y.astype(o_ref.dtype)
        return carry

    lax.fori_loop(0, n_chunks, body, 0, unroll=True)


@functools.partial(jax.jit, static_argnames=("tb",))
def _pdenet_batched(xt, w1c0, w1c1, b1s, w2s, b2, *, tb):
    """xt: (2, BP) f32 with BP % tb == 0. Returns (1, BP) f32."""
    npad, chunk = w1c0.shape
    bp = xt.shape[1]
    grid = (bp // tb,)
    return pl.pallas_call(
        pdenet_kernel,
        out_shape=jax.ShapeDtypeStruct((1, bp), jnp.float32),
        grid=grid,
        in_specs=[
            pl.BlockSpec((2, tb), lambda i: (0, i)),              # x tile
            pl.BlockSpec((npad, chunk), lambda i: (0, 0)),        # w1 col0 splat
            pl.BlockSpec((npad, chunk), lambda i: (0, 0)),        # w1 col1 splat
            pl.BlockSpec((npad, chunk), lambda i: (0, 0)),        # b1 splat
            pl.BlockSpec((npad, chunk), lambda i: (0, 0)),        # w2 splat (0-padded)
            pl.BlockSpec(memory_space=pltpu.MemorySpace.SMEM),    # b2 scalar
        ],
        out_specs=pl.BlockSpec((1, tb), lambda i: (0, i)),        # lane-dense out
        compiler_params=pltpu.CompilerParams(
            dimension_semantics=("parallel",)),
    )(xt, w1c0, w1c1, b1s, w2s, b2)


def _choose_tiling(b, tb):
    """Pick (tile, padded batch, inner chunk). All multiples of 128."""
    tb = _round_up(max(tb, 128), 128)
    bp128 = _round_up(max(b, 1), 128)
    # v7x: guarantee >=2 grid steps so the ("parallel",) axis actually splits
    # across the two TensorCores (no-op on single-TC v5e/v6e, and only binds
    # when the batch is small enough that one tile would swallow it).
    if bp128 >= 256:
        tb = min(tb, _round_up(bp128 // 2, 128))
    tb = min(tb, bp128)
    bp = _round_up(bp128, tb)
    # Inner lane chunk: keeps h=(NP, chunk) at ~16 live vregs (no spills).
    chunk = 128
    for c in (512, 256, 128):
        if tb % c == 0:
            chunk = c
            break
    return tb, bp, chunk


def pdenet_forward(x, w1, b1, w2, b2, *, tb=2048):
    """PDEnet forward for a single point ((2,)/(1,2)) or a batch (B, 2).

    Parameters are in torch layout: w1=(N,2) fc1.weight, b1=(N,) fc1.bias,
    w2=(1,N) fc2.weight, b2=(1,) fc2.bias. Returns float32 (B, 1)
    ((1, 1) for a single point), matching torch fc2(sigmoid(fc1(x))).
    """
    x = jnp.asarray(x, jnp.float32)
    if x.ndim != 2:
        x = x.reshape(-1, 2)
    assert x.ndim == 2 and x.shape[1] == 2
    b = x.shape[0]

    n = w1.shape[0]
    npad = _round_up(max(n, 8), 8)
    tb_eff, bp, chunk = _choose_tiling(b, tb)

    # Pad hidden dim (sublane axis) and lane-splat the grid-invariant weights
    # ONCE here (hoisted out of the kernel). Zero-padding W2 is REQUIRED so the
    # padded hidden units contribute nothing.
    w1f = jnp.asarray(w1, jnp.float32)
    w1c0 = jnp.zeros((npad, 1), jnp.float32).at[:n, 0].set(w1f[:, 0])
    w1c1 = jnp.zeros((npad, 1), jnp.float32).at[:n, 0].set(w1f[:, 1])
    b1p = jnp.zeros((npad, 1), jnp.float32).at[:n, 0].set(
        jnp.asarray(b1, jnp.float32).reshape(n))
    w2p = jnp.zeros((npad, 1), jnp.float32).at[:n, 0].set(
        jnp.asarray(w2, jnp.float32).reshape(n))
    w1c0s = jnp.broadcast_to(w1c0, (npad, chunk))
    w1c1s = jnp.broadcast_to(w1c1, (npad, chunk))
    b1s = jnp.broadcast_to(b1p, (npad, chunk))
    w2s = jnp.broadcast_to(w2p, (npad, chunk))
    b2v = jnp.asarray(b2, jnp.float32).reshape(1)

    # Transpose/pad so the batch rides the 128-wide lane axis: x^T is (2, BP).
    # TODO(synk): for very large collocation batches, fuse this transpose/pad
    # into the upstream producer (or accept (B,2) blocks and rearrange in-kernel)
    # to avoid the extra HBM read+write of x.
    xt = jnp.zeros((2, bp), jnp.float32).at[:, :b].set(x.T)

    out = _pdenet_batched(xt, w1c0s, w1c1s, b1s, w2s, b2v, tb=tb_eff)
    # Padded batch columns hold garbage (sigmoid(b1)·w2 + b2); slice them off.
    return out[0, :b].reshape(b, 1)


def init_params(key, n):
    """torch.nn.Linear-style uniform(+-1/sqrt(fan_in)) init, torch layouts."""
    k1, k2, k3, k4 = jax.random.split(key, 4)
    bd1 = 1.0 / jnp.sqrt(2.0)          # fc1 fan_in = 2
    bd2 = 1.0 / jnp.sqrt(float(n))     # fc2 fan_in = N
    w1 = jax.random.uniform(k1, (n, 2), jnp.float32, -bd1, bd1)   # fc1.weight
    b1 = jax.random.uniform(k2, (n,), jnp.float32, -bd1, bd1)     # fc1.bias
    w2 = jax.random.uniform(k3, (1, n), jnp.float32, -bd2, bd2)   # fc2.weight
    b2 = jax.random.uniform(k4, (1,), jnp.float32, -bd2, bd2)     # fc2.bias
    return w1, b1, w2, b2


def reference_forward(x, w1, b1, w2, b2):
    x = jnp.asarray(x, jnp.float32).reshape(-1, 2)
    h = jax.nn.sigmoid(x @ w1.T + b1)
    return h @ w2.T + b2


# TODO(synk): PDEnet.initial_condition/boundary/trial depend on an external
# linear_convection_solve and undefined attributes; only forward() is kernelized.

if __name__ == "__main__":
    N = 32  # hidden width (as in the torch module)
    key = jax.random.PRNGKey(0)
    kx, kp, kx2 = jax.random.split(key, 3)
    w1, b1, w2, b2 = init_params(kp, N)

    # Small batch (odd size -> exercises padding + the >=2-step grid split).
    B = 257
    xs = jax.random.uniform(kx, (B, 2), jnp.float32)
    out = jax.block_until_ready(pdenet_forward(xs, w1, b1, w2, b2))
    ref = reference_forward(xs, w1, b1, w2, b2)
    assert out.shape == (B, 1), out.shape
    assert jnp.allclose(out, ref, atol=1e-5, rtol=1e-4), (out[:4], ref[:4])

    # Larger batch -> exercises the big tile + inner unrolled chunk loop.
    B2 = 3000
    xs2 = jax.random.uniform(kx2, (B2, 2), jnp.float32)
    out2 = jax.block_until_ready(pdenet_forward(xs2, w1, b1, w2, b2))
    ref2 = reference_forward(xs2, w1, b1, w2, b2)
    assert out2.shape == (B2, 1), out2.shape
    assert jnp.allclose(out2, ref2, atol=1e-5, rtol=1e-4), (out2[:4], ref2[:4])

    # Single point: exactly the original torch forward semantics (1, 1).
    out1 = jax.block_until_ready(pdenet_forward(xs[0], w1, b1, w2, b2))
    assert out1.shape == (1, 1), out1.shape
    assert jnp.allclose(out1, ref[0:1], atol=1e-5, rtol=1e-4), (out1, ref[0:1])

    print("KERNEL_OK")
</pallas_src>

<mosaic_0001>
module attributes {stable_mosaic.version = 11 : i64} {
  func.func @pdenet_kernel(%arg0: i32, %arg1: memref<2x256xf32, #tpu.memory_space<vmem>>, %arg2: memref<32x256xf32, #tpu.memory_space<vmem>>, %arg3: memref<32x256xf32, #tpu.memory_space<vmem>>, %arg4: memref<32x256xf32, #tpu.memory_space<vmem>>, %arg5: memref<32x256xf32, #tpu.memory_space<vmem>>, %arg6: memref<1xf32, #tpu.memory_space<smem>>, %arg7: memref<1x256xf32, #tpu.memory_space<vmem>>) attributes {dimension_semantics = [#tpu.dimension_semantics<parallel>], iteration_bounds = array<i64: 2>, scalar_prefetch = 0 : i64, scratch_operands = 0 : i64, tpu.core_type = #tpu.core_type<tc>, window_params = [{transform_indices = @transform_0, window_bounds = array<i64: 2, 256>}, {pipeline_mode = #tpu.pipeline_mode<synchronous>, transform_indices = @transform_1, window_bounds = array<i64: 32, 256>}, {pipeline_mode = #tpu.pipeline_mode<synchronous>, transform_indices = @transform_2, window_bounds = array<i64: 32, 256>}, {pipeline_mode = #tpu.pipeline_mode<synchronous>, transform_indices = @transform_3, window_bounds = array<i64: 32, 256>}, {pipeline_mode = #tpu.pipeline_mode<synchronous>, transform_indices = @transform_4, window_bounds = array<i64: 32, 256>}, {transform_indices = @transform_5, window_bounds = array<i64: 1>}, {transform_indices = @transform_6, window_bounds = array<i64: 1, 256>}]} {
    %c0 = arith.constant 0 : index
    %0 = memref.load %arg6[%c0] : memref<1xf32, #tpu.memory_space<smem>>
    %c0_i32 = arith.constant 0 : i32
    %c256_i32 = arith.constant 256 : i32
    %1 = arith.muli %c0_i32, %c256_i32 : i32
    %2 = tpu.assume_multiple %1, 128 : i32
    %c0_0 = arith.constant 0 : index
    %3 = arith.index_cast %2 : i32 to index
    %4 = vector.load %arg1[%c0_0, %3] : memref<2x256xf32, #tpu.memory_space<vmem>>, vector<1x256xf32>
    %c1 = arith.constant 1 : index
    %5 = arith.index_cast %2 : i32 to index
    %6 = vector.load %arg1[%c1, %5] : memref<2x256xf32, #tpu.memory_space<vmem>>, vector<1x256xf32>
    %c0_1 = arith.constant 0 : index
    %c0_2 = arith.constant 0 : index
    %7 = vector.load %arg2[%c0_1, %c0_2] : memref<32x256xf32, #tpu.memory_space<vmem>>, vector<32x256xf32>
    %8 = vector.broadcast %4 : vector<1x256xf32> to vector<32x256xf32>
    %9 = arith.mulf %7, %8 : vector<32x256xf32>
    %c0_3 = arith.constant 0 : index
    %c0_4 = arith.constant 0 : index
    %10 = vector.load %arg3[%c0_3, %c0_4] : memref<32x256xf32, #tpu.memory_space<vmem>>, vector<32x256xf32>
    %11 = vector.broadcast %6 : vector<1x256xf32> to vector<32x256xf32>
    %12 = arith.mulf %10, %11 : vector<32x256xf32>
    %13 = arith.addf %9, %12 : vector<32x256xf32>
    %c0_5 = arith.constant 0 : index
    %c0_6 = arith.constant 0 : index
    %14 = vector.load %arg4[%c0_5, %c0_6] : memref<32x256xf32, #tpu.memory_space<vmem>>, vector<32x256xf32>
    %15 = arith.addf %13, %14 : vector<32x256xf32>
    %cst = arith.constant 5.000000e-01 : f32
    %16 = vector.broadcast %cst : f32 to vector<32x256xf32>
    %17 = arith.mulf %16, %15 : vector<32x256xf32>
    %18 = math.tanh %17 : vector<32x256xf32>
    %cst_7 = arith.constant 5.000000e-01 : f32
    %19 = vector.broadcast %cst_7 : f32 to vector<32x256xf32>
    %20 = arith.mulf %19, %18 : vector<32x256xf32>
    %cst_8 = arith.constant 5.000000e-01 : f32
    %21 = vector.broadcast %cst_8 : f32 to vector<32x256xf32>
    %22 = arith.addf %20, %21 : vector<32x256xf32>
    %c0_9 = arith.constant 0 : index
    %c0_10 = arith.constant 0 : index
    %23 = vector.load %arg5[%c0_9, %c0_10] : memref<32x256xf32, #tpu.memory_space<vmem>>, vector<32x256xf32>
    %24 = arith.mulf %22, %23 : vector<32x256xf32>
    %cst_11 = arith.constant dense<0.000000e+00> : vector<256xf32>
    %25 = vector.multi_reduction <add>, %24, %cst_11 [0] : vector<32x256xf32> to vector<256xf32>
    %26 = vector.shape_cast %25 : vector<256xf32> to vector<1x256xf32>
    %27 = vector.broadcast %0 : f32 to vector<1x256xf32>
    %28 = arith.addf %26, %27 : vector<1x256xf32>
    %c0_12 = arith.constant 0 : index
    %29 = arith.index_cast %2 : i32 to index
    %30 = vector.load %arg7[%c0_12, %29] : memref<1x256xf32, #tpu.memory_space<vmem>>, vector<1x256xf32>
    tpu.vector_store %arg7[%c0_12, %29], %28 {strides = array<i32>} : memref<1x256xf32, #tpu.memory_space<vmem>>, vector<1x256xf32>,
    %c1_i32 = arith.constant 1 : i32
    return
  }
  func.func @transform_0(%arg0: i32) -> (i32, i32) {
    %c0_i32 = arith.constant 0 : i32
    %c0_i32_0 = arith.constant 0 : i32
    return %c0_i32, %arg0 : i32, i32
  }
  func.func @transform_1(%arg0: i32) -> (i32, i32) {
    %c0_i32 = arith.constant 0 : i32
    %c0_i32_0 = arith.constant 0 : i32
    %c0_i32_1 = arith.constant 0 : i32
    return %c0_i32, %c0_i32_0 : i32, i32
  }
  func.func @transform_2(%arg0: i32) -> (i32, i32) {
    %c0_i32 = arith.constant 0 : i32
    %c0_i32_0 = arith.constant 0 : i32
    %c0_i32_1 = arith.constant 0 : i32
    return %c0_i32, %c0_i32_0 : i32, i32
  }
  func.func @transform_3(%arg0: i32) -> (i32, i32) {
    %c0_i32 = arith.constant 0 : i32
    %c0_i32_0 = arith.constant 0 : i32
    %c0_i32_1 = arith.constant 0 : i32
    return %c0_i32, %c0_i32_0 : i32, i32
  }
  func.func @transform_4(%arg0: i32) -> (i32, i32) {
    %c0_i32 = arith.constant 0 : i32
    %c0_i32_0 = arith.constant 0 : i32
    %c0_i32_1 = arith.constant 0 : i32
    return %c0_i32, %c0_i32_0 : i32, i32
  }
  func.func @transform_5(%arg0: i32) -> i32 {
    %c0_i32 = arith.constant 0 : i32
    %c0_i32_0 = arith.constant 0 : i32
    return %c0_i32 : i32
  }
  func.func @transform_6(%arg0: i32) -> (i32, i32) {
    %c0_i32 = arith.constant 0 : i32
    %c0_i32_0 = arith.constant 0 : i32
    return %c0_i32, %arg0 : i32, i32
  }
}

</mosaic_0001>

<bundles_post_ra>
// kernel: _pdenet_batched.1
= control target key start
LH: loop header
LB: loop body
LE: loop exit
PB: predicated region body
PF: predicated region fallthrough
CT: control target
= control target key end

     0   :  { %s1322_s0 = inlined_call_operand.hbm [shape: f32[2,512], index: 0, kind: input, shape index: {}]   ;;  %s1323_s1 = inlined_call_operand.hbm [shape: f32[32,256], index: 1, kind: input, shape index: {}]   ;;  %s1324_s2 = inlined_call_operand.hbm [shape: f32[32,256], index: 2, kind: input, shape index: {}]   ;;  %s1325_s3 = inlined_call_operand.hbm [shape: f32[32,256], index: 3, kind: input, shape index: {}]   ;;  %s1326_s4 = inlined_call_operand.hbm [shape: f32[32,256], index: 4, kind: input, shape index: {}]   ;;  %s1327_s5 = inlined_call_operand.<no memory space> [shape: f32[1], index: 5, kind: input, shape index: {}]   ;;  %s1328_s6 = inlined_call_operand.hbm [shape: f32[1,512], index: 6, kind: output, shape index: {}]  }
   0x1   :  { %11 = sst [smem:[#allocation2]] %s1327_s5 }
   0x2   :  { %12 = vsyncpa [#allocation4], 0 }
   0x3   :  { %14 = vsyncpa [#allocation4 + $0x1], 0 }
   0x4   :  { %15 = vsyncpa [#allocation7], 0 }
   0x5   :  { %16 = vsyncpa [#allocation10], 0 }
   0x6   :  { %17 = vsyncpa [#allocation5], 0 }
   0x7   :  { %19 = vsyncpa [#allocation5 + $0x1], 0  ;;  %s1022_s23 = smov 0   ;;  %s1024_s24 = smov 0  }
   0x8   :  { %s1026_s25 = smov 0   ;;  %s1028_s26 = smov 0  }
   0x9 LB: > { %s975_s5 = smov [#allocation6]   ;;  %s1043_s28 = sadd.s32 4294967295, %s973_s26   ;;  %s973_s26 = sphi %s1028_s26, %s1352_s26   ;;  %s969_s25 = sphi %s1026_s25, %s1351_s25   ;;  %s965_s24 = sphi %s1024_s24, %s1350_s24   ;;  %s961_s23 = sphi %s1022_s23, %s1349_s23  }
   0xa   : > { %s199_s27 = sshll.u32 %s975_s5, 4  ;;  %p627_p0 = scmp.ge.s32.totalorder %s973_s26, 1  ;;  %s1048_s27 = int_to_ptr.vmem [resolvable:$true] %s199_s27 }
   0xb   : > { %p1329_p1 = scmp.eq.s32.totalorder %s1043_s28, 0  ;;  %p187_p2 = scmp.lt.s32.totalorder %s973_s26, 3 }
   0xc   : > { %s976_s30 = smov [#allocation9]   ;;  %s977_s9 = smov [#allocation8]  }
   0xd   : > { %p1050_p3 = pnand %p627_p0, %p187_p2  ;;  %s225_s7 = sshll.u32 %s976_s30, 4  ;;  %s1063_s7 = int_to_ptr.vmem [resolvable:$true] %s225_s7 }
   0xe   : > { %s212_s10 = sshll.u32 %s977_s9, 4  ;;  %s757_s13 = scalar_lea.hbm %s1323_s1, 1024  ;;  %s1065_s10 = int_to_ptr.vmem [resolvable:$true] %s212_s10 }
   0xf   : > { %s1332_s29 = scalar_select %p1050_p3, 1, 0 }
  0x10   : > { %p671_p5 = pneg %p1050_p3  ;;  %p758_p7 = scmp.ne.s32.totalorder %s1323_s1, %s757_s13 }
  0x11   : > { %p764_p11 = scmp.lt.u32.totalorder %s757_s13, %s1323_s1 }
  0x12   : > { %p1059_p6 = pnand %p671_p5, %p1329_p1 }
  0x14   : > { %p1075_p8 = pneg %p1059_p6 }
  0x16   : > { %p760_p9 = pnand %p1075_p8, %p758_p7 }
  0x18   : > { %p761_p10 = pneg %p760_p9 }
  0x1a   : > { %p766_p12 = pnand %p764_p11, %p761_p10 }
  0x1c   : > { %769 = shalt.err (!%p766_p12)
}
  0x1d   : > { %s770_s19 = scalar_lea.vmem %s1048_s27, 1024  ;;  %p778_p5 = scmp.lt.s32.totalorder %s1048_s27, %s1048_s27 }
  0x1e   : > { %p771_p13 = scmp.ne.s32.totalorder %s1048_s27, %s770_s19  ;;  %p779_p4 = scmp.lt.s32.totalorder %s770_s19, %s770_s19 }
  0x20   : > { %p773_p0 = pnand %p771_p13, %p1075_p8  ;;  %p780_p7 = por %p779_p4, %p778_p5 }
  0x22   : > { %p774_p2 = pneg %p773_p0 }
  0x24   : > { %p781_p9 = pnand %p780_p7, %p774_p2 }
  0x26   : > { %784 = shalt.err (!%p781_p9)
}
  0x27   : > { %s978_s20 = smov 256   ;;  %s979_s21 = smov 16  }
  0x28   : > { %674 = dma.hbm_to_vmem [thread:$0]  (!%p1059_p6), %s1323_s1, 1024, %s1048_s27, [#allocation7], %s978_s20, %s978_s20, %s979_s21  }
  0x29   : > { %s785_s11 = scalar_lea.hbm %s1325_s3, 1024 }
  0x2a   : > { %p786_p4 = scmp.ne.s32.totalorder %s1325_s3, %s785_s11  ;;  %p792_p12 = scmp.lt.u32.totalorder %s785_s11, %s1325_s3 }
  0x2c   : > { %p788_p10 = pnand %p786_p4, %p1075_p8 }
  0x2e   : > { %p789_p11 = pneg %p788_p10 }
  0x30   : > { %p794_p13 = pnand %p792_p12, %p789_p11 }
  0x32   : > { %797 = shalt.err (!%p794_p13)
}
  0x33   : > { %s798_s27 = scalar_lea.vmem %s1063_s7, 1024  ;;  %p806_p7 = scmp.lt.s32.totalorder %s1063_s7, %s1063_s7 }
  0x34   : > { %p799_p0 = scmp.ne.s32.totalorder %s1063_s7, %s798_s27  ;;  %p807_p9 = scmp.lt.s32.totalorder %s798_s27, %s798_s27 }
  0x36   : > { %p801_p2 = pnand %p799_p0, %p1075_p8  ;;  %p808_p4 = por %p807_p9, %p806_p7 }
  0x38   : > { %p802_p5 = pneg %p801_p2 }
  0x3a   : > { %p809_p10 = pnand %p808_p4, %p802_p5 }
  0x3c   : > { %812 = shalt.err (!%p809_p10)
}
  0x3d   : > { %680 = dma.hbm_to_vmem [thread:$0]  (!%p1059_p6), %s1325_s3, 1024, %s1063_s7, [#allocation10], %s978_s20, %s978_s20, %s979_s21  }
  0x3e   : > { %s813_s5 = scalar_lea.hbm %s1324_s2, 1024 }
  0x3f   : > { %p814_p11 = scmp.ne.s32.totalorder %s1324_s2, %s813_s5  ;;  %p820_p0 = scmp.lt.u32.totalorder %s813_s5, %s1324_s2 }
  0x41   : > { %p816_p12 = pnand %p814_p11, %p1075_p8 }
  0x43   : > { %p817_p13 = pneg %p816_p12 }
  0x45   : > { %p822_p2 = pnand %p820_p0, %p817_p13 }
  0x47   : > { %825 = shalt.err (!%p822_p2)
}
  0x48   : > { %s826_s7 = scalar_lea.vmem %s1065_s10, 1024  ;;  %p834_p4 = scmp.lt.s32.totalorder %s1065_s10, %s1065_s10 }
  0x49   : > { %p827_p5 = scmp.ne.s32.totalorder %s1065_s10, %s826_s7  ;;  %p835_p10 = scmp.lt.s32.totalorder %s826_s7, %s826_s7 }
  0x4b   : > { %p829_p7 = pnand %p827_p5, %p1075_p8  ;;  %p836_p11 = por %p835_p10, %p834_p4 }
  0x4d   : > { %p830_p9 = pneg %p829_p7 }
  0x4f   : > { %p837_p12 = pnand %p836_p11, %p830_p9 }
  0x51   : > { %840 = shalt.err (!%p837_p12)
}
  0x52   : > { %677 = dma.hbm_to_vmem [thread:$0]  (!%p1059_p6), %s1324_s2, 1024, %s1065_s10, [#allocation7], %s978_s20, %s978_s20, %s979_s21  }
  0x53   : > { %s980_s15 = smov [#allocation11]   ;;  %s841_s19 = scalar_lea.hbm %s1326_s4, 1024 }
  0x54   : > { %s238_s27 = sshll.u32 %s980_s15, 4  ;;  %p842_p13 = scmp.ne.s32.totalorder %s1326_s4, %s841_s19  ;;  %s239_s27 = int_to_ptr.vmem [resolvable:$true] %s238_s27 }
  0x55   : > { %p848_p5 = scmp.lt.u32.totalorder %s841_s19, %s1326_s4 }
  0x56   : > { %p844_p0 = pnand %p842_p13, %p1075_p8 }
  0x58   : > { %p845_p2 = pneg %p844_p0 }
  0x5a   : > { %p850_p7 = pnand %p848_p5, %p845_p2 }
  0x5c   : > { %853 = shalt.err (!%p850_p7)
}
  0x5d   : > { %s854_s10 = scalar_lea.vmem %s239_s27, 1024  ;;  %p862_p11 = scmp.lt.s32.totalorder %s239_s27, %s239_s27 }
  0x5e   : > { %p855_p9 = scmp.ne.s32.totalorder %s239_s27, %s854_s10  ;;  %p863_p12 = scmp.lt.s32.totalorder %s854_s10, %s854_s10 }
  0x60   : > { %p857_p4 = pnand %p855_p9, %p1075_p8  ;;  %p864_p1 = por %p863_p12, %p862_p11 }
  0x62   : > { %p858_p10 = pneg %p857_p4 }
  0x64   : > { %p865_p3 = pnand %p864_p1, %p858_p10 }
  0x66   : > { %868 = shalt.err (!%p865_p3)
}
  0x67   : > { %683 = dma.hbm_to_vmem [thread:$0]  (!%p1059_p6), %s1326_s4, 1024, %s239_s27, [#allocation10], %s978_s20, %s978_s20, %s979_s21  }
  0x68   : > { %s626_s8 = sadd.s32 4294967294, %s973_s26   ;;  %s1174_s16 = sadd.s32 1, %s973_s26  }
  0x69   : > { %s29_s7 = ssub.s32 %s973_s26, %s1174_s16  ;;  %s32_s13 = sadd.s32 1, %s969_s25 }
  0x6a   : > { %p30_p1 = scmp.eq.s32.totalorder %s29_s7, 0  ;;  %p39_p3 = scmp.ne.s32.totalorder %s969_s25, %s965_s24 }
  0x6b   : > { %p40_p8 = scmp.eq.s32.totalorder %s973_s26, 0  ;;  %p45_p13 = scmp.ne.s32.totalorder %s965_s24, %s961_s23 }
  0x6c   : > { %s1185_s14 = scalar_select %p30_p1, %s969_s25, %s32_s13  }
  0x6d   : > { %p1187_p0 = por %p40_p8, %p39_p3  ;;  %p1336_p2 = scmp.eq.s32.totalorder %s1043_s28, 0 }
  0x6e   : > { %p174_p5 = scmp.eq.s32.totalorder %s1043_s28, 1  ;;  %p180_p7 = scmp.eq.s32.totalorder %s626_s8, 1 }
  0x6f   : > { %p1193_p6 = por %p1336_p2, %p45_p13  ;;  %p696_p9 = scmp.lt.s32.totalorder %s973_s26, 2 }
  0x70   : > { %s255_s21 = sand.u32 1, %s969_s25   ;;  %p1200_p4 = por %p174_p5, %p39_p3 }
  0x71   : > { %p1204_p10 = por %p180_p7, %p45_p13  ;;  %s633_s18 = sshll.u32 %s255_s21, 2 }
  0x72   : > { %s1338_s27 = scalar_select %p1200_p4, 1, 0 }
  0x73   : > { %s1339_s17 = scalar_select %p1204_p10, 1, 0 }
  0x74   : > { %s649_s19 = sshll.u32 %s973_s26, 6  ;;  %s259_s9 = scalar_lea.vmem [#allocation3], %s633_s18 }
  0x75   : > { %s1212_s30 = scalar_lea.hbm %s1322_s0, %s649_s19  ;;  %s267_s10 = sshll.u32 %s259_s9, 4  ;;  %s1214_s10 = int_to_ptr.vmem [resolvable:$true] %s267_s10 }
  0x76   : > { %p1218_p11 = pnand %p696_p9, %p1187_p0  ;;  %s256_s12 = scalar_lea.sflag [#allocation4], %s255_s21 }
  0x77   : > { %s869_s8 = scalar_lea.hbm %s1212_s30, 64  ;;  %s874_s18 = scalar_lea.hbm %s1322_s0, 128 }
  0x78   : > { %p870_p12 = scmp.ne.s32.totalorder %s1212_s30, %s869_s8  ;;  %p871_p1 = pneg %p1218_p11 }
  0x79   : > { %p875_p13 = scmp.lt.u32.totalorder %s1212_s30, %s1322_s0  ;;  %p876_p0 = scmp.lt.u32.totalorder %s874_s18, %s869_s8 }
  0x7a   : > { %p872_p3 = pnand %p871_p1, %p870_p12  ;;  %p878_p5 = scmp.lt.u32.totalorder %s869_s8, %s1212_s30 }
  0x7b   : > { %p877_p2 = por %p876_p0, %p875_p13 }
  0x7c   : > { %p873_p8 = pneg %p872_p3 }
  0x7d   : > { %p879_p7 = por %p878_p5, %p877_p2 }
  0x7f   : > { %p880_p9 = pnand %p879_p7, %p873_p8 }
  0x81   : > { %883 = shalt.err (!%p880_p9)
}
  0x82   : > { %s884_s21 = scalar_lea.vmem %s1214_s10, 64  ;;  %s981_s22 = smov [#allocation3]  }
  0x83   : > { %p885_p12 = scmp.ne.s32.totalorder %s1214_s10, %s884_s21  ;;  %s889_s5 = sshll.u32 %s981_s22, 4  ;;  %s890_s5 = int_to_ptr.vmem [resolvable:$false] %s889_s5 }
  0x84   : > { %s891_s9 = scalar_lea.vmem %s890_s5, 128  ;;  %p892_p4 = scmp.lt.s32.totalorder %s1214_s10, %s890_s5 }
  0x85   : > { %p887_p3 = pnand %p885_p12, %p871_p1  ;;  %p893_p13 = scmp.lt.s32.totalorder %s891_s9, %s884_s21 }
  0x87   : > { %p888_p10 = pneg %p887_p3  ;;  %p894_p0 = por %p893_p13, %p892_p4 }
  0x89   : > { %p895_p2 = pnand %p894_p0, %p888_p10 }
  0x8b   : > { %898 = shalt.err (!%p895_p2)
}
  0x8c   : > { %687 = dma.hbm_to_vmem [thread:$0]  (!%p1218_p11), %s1212_s30, 64, %s1214_s10, %s256_s12  }
  0x8d   : > { %p1341_p8 = scmp.ne.s32.totalorder %s1332_s29, 0 }
  0x8e   : > { %s1250_s8 = sand.u32 (!%p1341_p8), 1, %s965_s24  }
  0x8f   : > { %276 = sbr.rel (%p1341_p8) target bundleno = 235 (0xeb), region = 44  ;;  %s637_s7 = sshll.u32 (!%p1341_p8), %s1250_s8, 2 }
  0x90   : > { %s279_s13 = scalar_lea.sflag (!%p1341_p8), [#allocation4], %s1250_s8  ;;  %s282_s18 = scalar_lea.vmem (!%p1341_p8), [#allocation3], %s637_s7 }
  0x96   : > { %944 = dma.done.wait (%p1193_p6), %s279_s13, 64  }
  0x97   : > { %946 = vsyncadd (%p1193_p6), %s279_s13, 4294967232  ;;  %p1342_p4 = scmp.eq.s32.totalorder %s1043_s28, 0 }
  0x99   : > { %948 = dma.done.wait (%p1342_p4), [#allocation7], 2048   ;;  %p1343_p10 = pmov %p1342_p4 }
  0x9a   : > { %p1344_p11 = pmov %p1342_p4 }
  0x9b   : > { %950 = vsyncadd (%p1343_p10), [#allocation7], 4294965248 }
  0x9c   : > { %952 = dma.done.wait (%p1344_p11), [#allocation10], 2048   ;;  %p1345_p1 = pmov %p1342_p4 }
  0x9d   : > { %v342_v0 = vlaneseq  ;;  %v330_v4 = vld [vmem:[%s282_s18] ss:$2 sm:$0x3]  ;;  %v643_v5 = vld [vmem:[%s282_s18 + $0x1] ss:$2 sm:$0x3] }
  0x9e   : > { %954 = vsyncadd (%p1345_p1), [#allocation10], 4294965248  ;;  %v333_v6 = vld [vmem:[#allocation6] sm:$0xff]  ;;  %v334_v7 = vld [vmem:[#allocation6 + $0x8] sm:$0xff]  ;;  %s329_s29 = sld [smem:[#allocation2]]  ;;  %s642_s20 = sshll.u32 %s1250_s8, 1 }
  0x9f   : > { %v1267_v1 = vshrl.u32 %v342_v0, 7  ;;  %v335_v8 = vld [vmem:[#allocation6 + $0x10] sm:$0xff]  ;;  %v336_v13 = vld [vmem:[#allocation6 + $0x18] sm:$0xff]  ;;  %v337_v14 = vld [vmem:[#allocation6 + $0x20] sm:$0xff]  ;;  %s326_s30 = scalar_lea.vmem [#allocation12], %s642_s20  ;;  %s650_s11 = sshll.u32 %s1043_s28, 5 }
  0xa0   : > { %v338_v15 = vld [vmem:[#allocation6 + $0x28] sm:$0xff]  ;;  %v339_v16 = vld [vmem:[#allocation6 + $0x30] sm:$0xff]  ;;  %v340_v17 = vld [vmem:[#allocation6 + $0x38] sm:$0xff]  ;;  %s518_s10 = sshll.u32 %s326_s30, 4  ;;  %vm500_vm0 = vcmp.lt.s32.totalorder %v342_v0, 256  ;;  %s1280_s19 = scalar_lea.hbm %s1328_s6, %s650_s11  ;;  %s1275_s10 = int_to_ptr.vmem [resolvable:$true] %s518_s10 }
  0xa1   : > { %v344_v2 = vsub.s32 0, %v1267_v1  ;;  %v348_v3 = vsub.s32 1, %v1267_v1  ;;  %v360_v22 = vld [vmem:[#allocation8] sm:$0xff]  ;;  %v361_v27 = vld [vmem:[#allocation8 + $0x8] sm:$0xff]  ;;  %v362_v28 = vld [vmem:[#allocation8 + $0x10] sm:$0xff]  ;;  %s504_s21 = scalar_lea.sflag [#allocation5], %s1250_s8 }
  0xa2   : > { %v363_v29 = vld [vmem:[#allocation8 + $0x18] sm:$0xff]  ;;  %v364_v30 = vld [vmem:[#allocation8 + $0x20] sm:$0xff]  ;;  %v365_v31 = vld [vmem:[#allocation8 + $0x28] sm:$0xff]  ;;  %s899_s22 = scalar_lea.vmem %s1275_s10, 32  ;;  %p1346_p5 = scmp.ne.s32.totalorder %s1338_s27, 0 }
  0xa3   : > { %v345_v9 = vrot.slane %v330_v4, %v344_v2  ;;  %v349_v10 = vrot.slane %v330_v4, %v348_v3  ;;  %v372_v11 = vrot.slane %v643_v5, %v344_v2  ;;  %v376_v12 = vrot.slane %v643_v5, %v348_v3  ;;  %v366_v32 = vld [vmem:[#allocation8 + $0x30] sm:$0xff]  ;;  %v367_v37 = vld [vmem:[#allocation8 + $0x38] sm:$0xff]  ;;  %v395_v41 = vld [vmem:[#allocation9] sm:$0xff]  ;;  %p900_p6 = scmp.ne.s32.totalorder %s1275_s10, %s899_s22  ;;  %s983_s28 = smov [#allocation12]  }
  0xa4   : > { %v396_v42 = vld [vmem:[#allocation9 + $0x8] sm:$0xff]  ;;  %v397_v47 = vld [vmem:[#allocation9 + $0x10] sm:$0xff]  ;;  %v398_v48 = vld [vmem:[#allocation9 + $0x18] sm:$0xff]  ;;  %s903_s5 = sshll.u32 %s983_s28, 4  ;;  %s904_s5 = int_to_ptr.vmem [resolvable:$false] %s903_s5 }
  0xa5   : > { %v352_v18 = vmul.f32 %v345_v9, %v333_v6  ;;  %v353_v19 = vmul.f32 %v349_v10, %v334_v7  ;;  %v354_v20 = vmul.f32 %v345_v9, %v335_v8  ;;  %v355_v21 = vmul.f32 %v349_v10, %v336_v13  ;;  %v399_v49 = vld [vmem:[#allocation9 + $0x20] sm:$0xff]  ;;  %v400_v54 = vld [vmem:[#allocation9 + $0x28] sm:$0xff]  ;;  %v401_v55 = vld [vmem:[#allocation9 + $0x30] sm:$0xff]  ;;  %p901_p7 = pnand %p900_p6, %p1346_p5  ;;  %s905_s9 = scalar_lea.vmem %s904_s5, 64 }
  0xa6   : > { %v356_v23 = vmul.f32 %v345_v9, %v337_v14  ;;  %v357_v24 = vmul.f32 %v349_v10, %v338_v15  ;;  %v358_v25 = vmul.f32 %v345_v9, %v339_v16  ;;  %v359_v26 = vmul.f32 %v349_v10, %v340_v17  ;;  %v402_v57 = vld [vmem:[#allocation9 + $0x38] sm:$0xff]  ;;  %v443_v17 = vld [vmem:[#allocation11] sm:$0xff]  ;;  %p906_p12 = scmp.lt.s32.totalorder %s1275_s10, %s904_s5  ;;  %p907_p3 = scmp.lt.s32.totalorder %s905_s9, %s899_s22 }
  0xa7   : > { %v379_v33 = vmul.f32 %v372_v11, %v360_v22  ;;  %v380_v34 = vmul.f32 %v376_v12, %v361_v27  ;;  %v381_v35 = vmul.f32 %v372_v11, %v362_v28  ;;  %v382_v36 = vmul.f32 %v376_v12, %v363_v29  ;;  %v446_v29 = vld [vmem:[#allocation11 + $0x18] sm:$0xff]  ;;  %p902_p9 = pneg %p901_p7 }
  0xa8   : > { %v383_v38 = vmul.f32 %v372_v11, %v364_v30  ;;  %v384_v39 = vmul.f32 %v376_v12, %v365_v31  ;;  %v385_v40 = vmul.f32 %v372_v11, %v366_v32  ;;  %v386_v43 = vmul.f32 %v376_v12, %v367_v37  ;;  %p908_p13 = por %p907_p3, %p906_p12 }
  0xa9   : > { %v387_v44 = vadd.f32 %v379_v33, %v352_v18  ;;  %v388_v45 = vadd.f32 %v380_v34, %v353_v19  ;;  %v389_v46 = vadd.f32 %v381_v35, %v354_v20  ;;  %v390_v50 = vadd.f32 %v382_v36, %v355_v21  ;;  %v444_v21 = vld [vmem:[#allocation11 + $0x8] sm:$0xff]  ;;  %v447_v34 = vld [vmem:[#allocation11 + $0x20] sm:$0xff] }
  0xaa   : > { %v391_v51 = vadd.f32 %v383_v38, %v356_v23  ;;  %v392_v52 = vadd.f32 %v384_v39, %v357_v24  ;;  %v393_v53 = vadd.f32 %v385_v40, %v358_v25  ;;  %v394_v56 = vadd.f32 %v386_v43, %v359_v26  ;;  %v445_v25 = vld [vmem:[#allocation11 + $0x10] sm:$0xff]  ;;  %v448_v39 = vld [vmem:[#allocation11 + $0x28] sm:$0xff]  ;;  %p909_p0 = pnand %p908_p13, %p902_p9 }
  0xab   : > { %v403_v58 = vadd.f32 %v395_v41, %v387_v44  ;;  %v404_v59 = vadd.f32 %v396_v42, %v388_v45  ;;  %v405_v60 = vadd.f32 %v397_v47, %v389_v46  ;;  %v406_v61 = vadd.f32 %v398_v48, %v390_v50  ;;  %v449_v43 = vld [vmem:[#allocation11 + $0x30] sm:$0xff]  ;;  %v450_v46 = vld [vmem:[#allocation11 + $0x38] sm:$0xff] }
  0xac   : > { %v407_v62 = vadd.f32 %v399_v49, %v391_v51  ;;  %v408_v63 = vadd.f32 %v400_v54, %v392_v52  ;;  %v409_v2 = vadd.f32 %v401_v55, %v393_v53  ;;  %v410_v6 = vadd.f32 %v402_v57, %v394_v56 }
  0xad   : > { %v411_v3 = vmul.f32 0.5, %v403_v58  ;;  %v412_v4 = vmul.f32 0.5, %v404_v59  ;;  %v413_v5 = vmul.f32 0.5, %v405_v60  ;;  %v414_v7 = vmul.f32 0.5, %v406_v61 }
  0xae   : > { %v415_v8 = vmul.f32 0.5, %v407_v62  ;;  %v416_v9 = vmul.f32 0.5, %v408_v63  ;;  %v417_v10 = vmul.f32 0.5, %v409_v2  ;;  %v418_v11 = vmul.f32 0.5, %v410_v6 }
  0xaf   : > { %741 = vtanh.f32 %v411_v3  ;;  %v982_v2 = vmov 1966171168  }
  0xb0   : > { %743 = vtanh.f32 %v412_v4  ;;  %v484_v3 = vunpack.c.l.s4 %v982_v2 }
  0xb1   : > { %745 = vtanh.f32 %v413_v5 }
  0xb2   : > { %747 = vtanh.f32 %v414_v7 }
  0xb3   : > { %749 = vtanh.f32 %v415_v8  ;;  %v477_v8 = vstv %s329_s29 }
  0xb4   : > { %751 = vtanh.f32 %v416_v9  ;;  %v485_v9 = vunpack.c.0.s8 %v484_v3 }
  0xb5   : > { %753 = vtanh.f32 %v417_v10 }
  0xb6   : > { %755 = vtanh.f32 %v418_v11 }
  0xb9   : > { %v742_v12 = vpop.eup %741 }
  0xba   : > { %v744_v13 = vpop.eup %743  ;;  %v427_v14 = vmul.f32 0.5, %v742_v12 }
  0xbb   : > { %v746_v15 = vpop.eup %745  ;;  %v428_v16 = vmul.f32 0.5, %v744_v13 }
  0xbc   : > { %v748_v18 = vpop.eup %747  ;;  %v429_v19 = vmul.f32 0.5, %v746_v15  ;;  %v435_v20 = vadd.f32 0.5, %v427_v14  ;;  %v488_v14 = vsub.s32 %v485_v9, %v1267_v1 }
  0xbd   : > { %v750_v22 = vpop.eup %749  ;;  %v430_v23 = vmul.f32 0.5, %v748_v18  ;;  %v436_v24 = vadd.f32 0.5, %v428_v16 }
  0xbe   : > { %v752_v26 = vpop.eup %751  ;;  %v431_v27 = vmul.f32 0.5, %v750_v22  ;;  %v437_v28 = vadd.f32 0.5, %v429_v19  ;;  %v451_v30 = vmul.f32 %v443_v17, %v435_v20 }
  0xbf   : > { %v754_v31 = vpop.eup %753  ;;  %v432_v32 = vmul.f32 0.5, %v752_v26  ;;  %v438_v33 = vadd.f32 0.5, %v430_v23  ;;  %v452_v35 = vmul.f32 %v444_v21, %v436_v24 }
  0xc0   : > { %v756_v36 = vpop.eup %755  ;;  %v433_v37 = vmul.f32 0.5, %v754_v31  ;;  %v439_v38 = vadd.f32 0.5, %v431_v27  ;;  %v453_v40 = vmul.f32 %v445_v25, %v437_v28 }
  0xc1   : > { %v434_v41 = vmul.f32 0.5, %v756_v36  ;;  %v440_v42 = vadd.f32 0.5, %v432_v32  ;;  %v454_v44 = vmul.f32 %v446_v29, %v438_v33 }
  0xc2   : > { %v441_v45 = vadd.f32 0.5, %v433_v37  ;;  %v455_v47 = vmul.f32 %v447_v34, %v439_v38  ;;  %v459_v48 = vadd.f32 %v453_v40, %v451_v30 }
  0xc3   : > { %v442_v49 = vadd.f32 0.5, %v434_v41  ;;  %v456_v50 = vmul.f32 %v448_v39, %v440_v42  ;;  %v468_v51 = vadd.f32 %v454_v44, %v452_v35 }
  0xc4   : > { %v457_v52 = vmul.f32 %v449_v43, %v441_v45  ;;  %v460_v53 = vadd.f32 %v459_v48, %v455_v47 }
  0xc5   : > { %v458_v54 = vmul.f32 %v450_v46, %v442_v49  ;;  %v469_v55 = vadd.f32 %v468_v51, %v456_v50 }
  0xc6   : > { %v461_v56 = vadd.f32 %v460_v53, %v457_v52 }
  0xc7   : > { %v470_v57 = vadd.f32 %v469_v55, %v458_v54 }
  0xc8   : > { %v462_v58 = vrot.slane %v461_v56, 4 }
  0xc9   : > { %v471_v59 = vrot.slane %v470_v57, 4 }
  0xca   : > { %v463_v60 = vadd.f32 %v462_v58, %v461_v56 }
  0xcb   : > { %v472_v61 = vadd.f32 %v471_v59, %v470_v57 }
  0xcc   : > { %v464_v62 = vrot.slane %v463_v60, 2 }
  0xcd   : > { %v473_v63 = vrot.slane %v472_v61, 2 }
  0xce   : > { %v465_v4 = vadd.f32 %v464_v62, %v463_v60 }
  0xcf   : > { %v474_v5 = vadd.f32 %v473_v63, %v472_v61 }
  0xd0   : > { %v466_v6 = vrot.slane %v465_v4, 1 }
  0xd1   : > { %v475_v7 = vrot.slane %v474_v5, 1 }
  0xd2   : > { %v467_v10 = vadd.f32 %v466_v6, %v465_v4 }
  0xd3   : > { %v476_v11 = vadd.f32 %v475_v7, %v474_v5 }
  0xd4   : > { %v478_v12 = vadd.f32 %v477_v8, %v467_v10 }
  0xd5   : > { %v479_v13 = vadd.f32 %v477_v8, %v476_v11 }
  0xd7   : > { %v482_v15 = vcombine.low %v478_v12, %v479_v13 }
  0xd9   : > { %v489_v16 = vrot.slane %v482_v15, %v488_v14 }
  0xdb   : > { %v496_v17 = vrot.slane %v489_v16, %v488_v14 }
  0xdd   : > { %502 = vst.msk [vmem:[%s326_s30] sm:$0x3] %vm500_vm0, %v496_v17 }
  0xde   : > { %912 = shalt.err (!%p909_p0)
}
  0xdf   : > { %s913_s8 = scalar_lea.hbm %s1280_s19, 32  ;;  %s917_s18 = scalar_lea.hbm %s1328_s6, 64 }
  0xe0   : > { %p914_p2 = scmp.ne.s32.totalorder %s1280_s19, %s913_s8  ;;  %p918_p10 = scmp.lt.u32.totalorder %s1280_s19, %s1328_s6 }
  0xe1   : > { %p919_p11 = scmp.lt.u32.totalorder %s917_s18, %s913_s8  ;;  %p921_p6 = scmp.lt.u32.totalorder %s913_s8, %s1280_s19 }
  0xe2   : > { %p915_p8 = pnand %p914_p2, %p1346_p5 }
  0xe3   : > { %p920_p1 = por %p919_p11, %p918_p10 }
  0xe4   : > { %p916_p4 = pneg %p915_p8 }
  0xe5   : > { %p922_p7 = por %p921_p6, %p920_p1 }
  0xe7   : > { %p923_p9 = pnand %p922_p7, %p916_p4 }
  0xe9   : > { %926 = shalt.err (!%p923_p9)
}
  0xea   : > { %669 = dma.vmem_to_hbm [thread:$0]  (%p1346_p5), %s1275_s10, 32, %s1280_s19, %s504_s21  }
  0xeb PF: > { %s530_s30 = sand.u32 1, %s961_s23   ;;  %p1347_p12 = scmp.ne.s32.totalorder %s1339_s17, 0 }
  0xec   : > { %p1348_p3 = scmp.ge.s32.totalorder %s973_s26, 2  ;;  %s531_s11 = scalar_lea.sflag [#allocation5], %s530_s30 }
  0xee   : > { %p689_p13 = pnand %p1348_p3, %p1347_p12 }
  0xf0   : > { %956 = dma.done.wait (!%p689_p13), %s531_s11, 32  }
  0xf1   : > { %958 = vsyncadd (!%p689_p13), %s531_s11, 4294967264  ;;  %p22_p0 = scmp.ge.s32.totalorder %s1174_s16, 4   ;;  %s1349_s23 = smov %s965_s24 }
  0xf2   : > { %s1350_s24 = smov %s969_s25  ;;  %s1351_s25 = smov %s1185_s14 }
  0xf3   : > { %s1352_s26 = smov %s1174_s16  ;;  %24 = sbr.rel (!%p22_p0) target bundleno = 9 (0x9), region = 106 }
  0xfa   :  { %536 = vsyncpa [#allocation4], 1 }
  0xfb   :  { %538 = vsyncpa [#allocation4 + $0x1], 1 }
  0xfc   :  { %539 = vsyncpa [#allocation7], 1 }
  0xfd   :  { %540 = vsyncpa [#allocation10], 1 }
  0xfe   :  { %541 = vsyncpa [#allocation5], 1 }
  0xff   :  { %543 = vsyncpa [#allocation5 + $0x1], 1 }

</bundles_post_ra>
